<compile_context>
chip_gen: v7x
topology: tpu7x:2x2x1
jax: 0.10.0
libtpu: 0.0.40
codegen_flags: <defaults>
</compile_context>

<pallas_src>
import jax
import jax.numpy as jnp
from jax.experimental import pallas as pl
from jax.experimental.pallas import tpu as pltpu


def _attention_pooling_kernel(x_ref, mask_ref, w_ref, bias_ref, o_ref,
                              m_sc, l_sc, acc_sc):
    # x_ref   : (TB, TS, H) hidden states, native dtype
    # mask_ref: (TB, TS)    int32 attention mask (0 = masked)
    # w_ref   : (1, 1, H)   f32 attention weight row (block index is constant)
    # bias_ref: (1,)        f32 Linear bias (SMEM scalar)
    # o_ref   : (TB, H)     pooled output (written on the last sequence step)
    # scratch : m_sc (TB,1) running max, l_sc (TB,1) running denom,
    #           acc_sc (TB,H) running unnormalized weighted sum (all f32)
    s_idx = pl.program_id(1)

    @pl.when(s_idx == 0)
    def _init():
        m_sc[...] = jnp.full_like(m_sc, -jnp.inf)
        l_sc[...] = jnp.zeros_like(l_sc)
        acc_sc[...] = jnp.zeros_like(acc_sc)

    x = x_ref[...]

    # ---- attention scores on the VPU/XLU, f32 accumulation ----
    # (1,1,H) weight broadcasts implicitly; no per-step broadcast_to / MXU pass.
    raw = jnp.sum(x * w_ref[...], axis=-1)                 # (TB, TS) f32
    scores = jnp.where(mask_ref[...] != 0,
                       raw + bias_ref[0],
                       jnp.float32(-1e9))                  # exact masked_fill

    # ---- online softmax over the (tiled) sequence axis ----
    m_prev = m_sc[...]                                     # (TB, 1)
    m_new = jnp.maximum(m_prev, jnp.max(scores, axis=-1, keepdims=True))
    alpha = jnp.exp(m_prev - m_new)                        # exp(-inf)=0 on step 0
    ex = jnp.exp(scores - m_new)                           # (TB, TS) f32
    l_sc[...] = alpha * l_sc[...] + jnp.sum(ex, axis=-1, keepdims=True)

    # ---- unnormalized weighted partial sum: one MXU pass over x ----
    part = jnp.einsum("tks,tsh->tkh",
                      ex.astype(x.dtype)[:, None, :], x,
                      preferred_element_type=jnp.float32)  # (TB, 1, H)
    acc_sc[...] = alpha * acc_sc[...] + jnp.squeeze(part, axis=1)
    m_sc[...] = m_new

    @pl.when(s_idx == pl.num_programs(1) - 1)
    def _finalize():
        # exact normalization; the divide hides completely under the DMA stream
        o_ref[...] = (acc_sc[...] / l_sc[...]).astype(o_ref.dtype)


def _vmem_capacity_bytes():
    # 128 MiB on v5e/v6e, 64 MiB per TensorCore on v7x.
    try:
        return int(pltpu.get_tpu_info().vmem_capacity_bytes)
    except Exception:
        return 64 * 1024 * 1024  # conservative (v7x per-core VMEM)


def _choose_tiles(B, S, H, x_itemsize, vmem_capacity):
    """Pick (tb, ts) per the review:
      * x-tiles ~2-8 MiB (a few MiB already reaches ~85% of HBM roofline);
        sizing to all of VMEM only lengthens the exposed prologue/epilogue.
      * >=2 batch grid steps when B allows (v7x dual-TC sharding of the
        'parallel' axis), >=4 total steps when possible.
      * (8,128) rule: tb multiple of 8 or tb == B; ts a 128-multiple divisor
        of S (no padded sequence chunks) or ts == S.
      * when even an 8-row batch tile is too large (long S / big H), tile the
        sequence axis instead; the kernel's online softmax makes this exact."""
    TARGET = 4 << 20                          # ~4 MiB x-tile sweet spot
    CEIL = max(TARGET, vmem_capacity // 12)   # x-tile cap (bufs + f32 temps)

    # ---- sequence tile --------------------------------------------------
    ts = S
    if S % 128 == 0 and 8 * S * H * x_itemsize > 2 * TARGET:
        ts = 128                              # 128 always divides S here
        cand = 128
        while cand < S:
            if S % cand == 0 and 8 * cand * H * x_itemsize <= TARGET:
                ts = cand                     # largest lane-aligned divisor <= target
            cand += 128
    # NOTE: if S % 128 != 0 and a single (S, H) row is enormous, the row must
    # still fit in VMEM (pad S to a multiple of 128 upstream in that case).
    grid_s = S // ts

    # ---- batch tile -----------------------------------------------------
    per_row = ts * H * x_itemsize
    if B <= 8:
        tb = B                                # tb == B satisfies the sublane rule
    else:
        tb = max(8, min(B, TARGET // max(per_row, 1)) // 8 * 8)
        tb = min(tb, max(8, (CEIL // max(per_row, 1)) // 8 * 8))
        # keep >=2 batch steps (v7x dual-TC) and >=4 total steps when possible
        min_bsteps = 2 if grid_s >= 2 else 4
        tb = min(tb, max(8, (-(-B // min_bsteps)) // 8 * 8))
        # prefer a tb that divides B (avoids a padded last batch block)
        t = tb
        while t > 8 and B % t != 0:
            t -= 8
        if B % t == 0:
            tb = t
    return tb, ts


def attention_pooling(last_hidden_state, weight, bias, attention_mask=None):
    """last_hidden_state: [B, S, H]; weight: [1, H]; bias: [1];
    attention_mask: optional [B, S]. Returns [B, H] (same dtype as x)."""
    B, S, H = last_hidden_state.shape
    x_dtype = last_hidden_state.dtype
    itemsize = jnp.dtype(x_dtype).itemsize

    w3 = jnp.asarray(weight, jnp.float32).reshape(1, 1, H)
    b1 = jnp.asarray(bias, jnp.float32).reshape(1)
    if attention_mask is None:
        mask = jnp.ones((B, S), jnp.int32)        # 1/H of x traffic: negligible
    else:
        mask = (attention_mask != 0).astype(jnp.int32)

    capacity = _vmem_capacity_bytes()
    tb, ts = _choose_tiles(B, S, H, itemsize, capacity)
    grid_b = pl.cdiv(B, tb)
    grid_s = S // ts

    # ---- VMEM footprint (actual, not double-counted) --------------------
    def rup(v, m):
        return -(-v // m) * m

    x_block = tb * ts * H * itemsize
    mask_blk = rup(tb, 8) * rup(ts, 128) * 4
    out_blk = rup(tb, 8) * rup(H, 128) * itemsize
    w_blk = 8 * rup(H, 128) * 4
    scratch = rup(tb, 8) * rup(H, 128) * 4 + 2 * rup(tb, 8) * 128 * 4
    temps = tb * ts * H * 4 + 8 * rup(tb, 8) * rup(ts, 128) * 4  # f32 x*w, scores/ex
    footprint = (2 * x_block + 2 * (mask_blk + out_blk + w_blk) + scratch + temps)
    vmem_limit = int(min(capacity, max(2 * footprint + (8 << 20), 48 << 20)))

    cost = pl.CostEstimate(
        flops=4 * B * S * H,
        transcendentals=2 * B * S,
        bytes_accessed=(B * S * H * itemsize + B * S * 4
                        + B * H * itemsize + H * 4))

    out = pl.pallas_call(
        _attention_pooling_kernel,
        out_shape=jax.ShapeDtypeStruct((B, H), x_dtype),
        grid_spec=pltpu.PrefetchScalarGridSpec(
            num_scalar_prefetch=0,
            grid=(grid_b, grid_s),
            in_specs=[
                pl.BlockSpec((tb, ts, H), lambda b, s: (b, s, 0)),
                pl.BlockSpec((tb, ts), lambda b, s: (b, s)),
                pl.BlockSpec((1, 1, H), lambda b, s: (0, 0, 0)),
                pl.BlockSpec(memory_space=pltpu.MemorySpace.SMEM),
            ],
            out_specs=pl.BlockSpec((tb, H), lambda b, s: (b, 0)),
            scratch_shapes=[
                pltpu.VMEM((tb, 1), jnp.float32),   # running max
                pltpu.VMEM((tb, 1), jnp.float32),   # running denom
                pltpu.VMEM((tb, H), jnp.float32),   # running weighted sum
            ],
        ),
        compiler_params=pltpu.CompilerParams(
            dimension_semantics=("parallel", "arbitrary"),
            vmem_limit_bytes=vmem_limit),
        cost_estimate=cost,
    )(last_hidden_state, mask, w3, b1)
    return out


def _reference(last_hidden_state, weight, bias, attention_mask=None):
    x = last_hidden_state.astype(jnp.float32)
    scores = jnp.einsum("bsh,h->bs", x, weight.reshape(-1).astype(jnp.float32))
    scores = scores + jnp.asarray(bias, jnp.float32).reshape(())
    if attention_mask is not None:
        scores = jnp.where(attention_mask == 0, jnp.float32(-1e9), scores)
    w = jax.nn.softmax(scores, axis=-1)
    return jnp.einsum("bs,bsh->bh", w, x)


if __name__ == "__main__":
    key = jax.random.PRNGKey(0)
    k1, k2, k3, k4, k5, k6 = jax.random.split(key, 6)

    # ---- small shapes consistent with the module -----------------------
    B, S, H = 2, 8, 32
    x = jax.random.normal(k1, (B, S, H), dtype=jnp.float32)
    weight = jax.random.normal(k2, (1, H), dtype=jnp.float32) * 0.1
    bias = jnp.array([0.05], dtype=jnp.float32)
    attention_mask = (jax.random.uniform(k3, (B, S)) > 0.25).astype(jnp.int32)

    out = jax.block_until_ready(
        attention_pooling(x, weight, bias, attention_mask))
    ref = _reference(x, weight, bias, attention_mask)
    assert out.shape == (B, H)
    assert jnp.allclose(out, ref, atol=1e-4, rtol=1e-4), (
        float(jnp.max(jnp.abs(out - ref))))

    # no-mask path
    out_nm = jax.block_until_ready(attention_pooling(x, weight, bias, None))
    ref_nm = _reference(x, weight, bias, None)
    assert jnp.allclose(out_nm, ref_nm, atol=1e-4, rtol=1e-4)

    # ---- larger shapes: exercises batch tiling (2 steps), sequence tiling
    #      (online softmax over 4 chunks) and a fully-masked row ------------
    B2, S2, H2 = 16, 2048, 256
    x2 = jax.random.normal(k4, (B2, S2, H2), dtype=jnp.float32)
    w2 = jax.random.normal(k5, (1, H2), dtype=jnp.float32) * 0.05
    b2 = jnp.array([-0.1], dtype=jnp.float32)
    m2 = (jax.random.uniform(k6, (B2, S2)) > 0.2).astype(jnp.int32)
    m2 = m2.at[3].set(0)  # fully-masked row -> uniform average (matches torch)

    out2 = jax.block_until_ready(attention_pooling(x2, w2, b2, m2))
    ref2 = _reference(x2, w2, b2, m2)
    assert out2.shape == (B2, H2)
    assert jnp.allclose(out2, ref2, atol=1e-4, rtol=1e-4), (
        float(jnp.max(jnp.abs(out2 - ref2))))

    print("KERNEL_OK")
</pallas_src>

<mosaic_0001>
module attributes {stable_mosaic.version = 11 : i64} {
  func.func @_attention_pooling_kernel(%arg0: i32, %arg1: i32, %arg2: memref<2x8x32xf32, #tpu.memory_space<vmem>>, %arg3: memref<2x8xi32, #tpu.memory_space<vmem>>, %arg4: memref<1x1x32xf32, #tpu.memory_space<vmem>>, %arg5: memref<1xf32, #tpu.memory_space<smem>>, %arg6: memref<2x32xf32, #tpu.memory_space<vmem>>, %arg7: memref<2x1xf32, #tpu.memory_space<vmem>>, %arg8: memref<2x1xf32, #tpu.memory_space<vmem>>, %arg9: memref<2x32xf32, #tpu.memory_space<vmem>>) attributes {dimension_semantics = [#tpu.dimension_semantics<parallel>, #tpu.dimension_semantics<arbitrary>], iteration_bounds = array<i64: 1, 1>, scalar_prefetch = 0 : i64, scratch_operands = 3 : i64, tpu.core_type = #tpu.core_type<tc>, window_params = [{transform_indices = @transform_0, window_bounds = array<i64: 2, 8, 32>}, {transform_indices = @transform_1, window_bounds = array<i64: 2, 8>}, {pipeline_mode = #tpu.pipeline_mode<synchronous>, transform_indices = @transform_2, window_bounds = array<i64: 1, 1, 32>}, {transform_indices = @transform_3, window_bounds = array<i64: 1>}, {transform_indices = @transform_4, window_bounds = array<i64: 2, 32>}]} {
    %c0_i32 = arith.constant 0 : i32
    %0 = arith.cmpi eq, %arg1, %c0_i32 : i32
    %1 = arith.extui %0 : i1 to i32
    %c0_i32_0 = arith.constant 0 : i32
    %2 = arith.cmpi ne, %1, %c0_i32_0 : i32
    scf.if %2 {
      %cst_28 = arith.constant 0xFF800000 : f32
      %43 = vector.broadcast %cst_28 : f32 to vector<2x1xf32>
      %c0_29 = arith.constant 0 : index
      %c0_30 = arith.constant 0 : index
      %44 = vector.load %arg7[%c0_29, %c0_30] : memref<2x1xf32, #tpu.memory_space<vmem>>, vector<2x1xf32>
      tpu.vector_store %arg7[%c0_29, %c0_30], %43 {strides = array<i32>} : memref<2x1xf32, #tpu.memory_space<vmem>>, vector<2x1xf32>,
      %cst_31 = arith.constant 0.000000e+00 : f32
      %45 = vector.broadcast %cst_31 : f32 to vector<2x1xf32>
      %c0_32 = arith.constant 0 : index
      %c0_33 = arith.constant 0 : index
      %46 = vector.load %arg8[%c0_32, %c0_33] : memref<2x1xf32, #tpu.memory_space<vmem>>, vector<2x1xf32>
      tpu.vector_store %arg8[%c0_32, %c0_33], %45 {strides = array<i32>} : memref<2x1xf32, #tpu.memory_space<vmem>>, vector<2x1xf32>,
      %cst_34 = arith.constant 0.000000e+00 : f32
      %47 = vector.broadcast %cst_34 : f32 to vector<2x32xf32>
      %c0_35 = arith.constant 0 : index
      %c0_36 = arith.constant 0 : index
      %48 = vector.load %arg9[%c0_35, %c0_36] : memref<2x32xf32, #tpu.memory_space<vmem>>, vector<2x32xf32>
      tpu.vector_store %arg9[%c0_35, %c0_36], %47 {strides = array<i32>} : memref<2x32xf32, #tpu.memory_space<vmem>>, vector<2x32xf32>,
    } else {
    }
    %c0 = arith.constant 0 : index
    %c0_1 = arith.constant 0 : index
    %c0_2 = arith.constant 0 : index
    %3 = vector.load %arg2[%c0, %c0_1, %c0_2] : memref<2x8x32xf32, #tpu.memory_space<vmem>>, vector<2x8x32xf32>
    %c0_3 = arith.constant 0 : index
    %c0_4 = arith.constant 0 : index
    %c0_5 = arith.constant 0 : index
    %4 = vector.load %arg4[%c0_3, %c0_4, %c0_5] : memref<1x1x32xf32, #tpu.memory_space<vmem>>, vector<1x1x32xf32>
    %5 = vector.broadcast %4 : vector<1x1x32xf32> to vector<2x8x32xf32>
    %6 = arith.mulf %3, %5 : vector<2x8x32xf32>
    %cst = arith.constant dense<0.000000e+00> : vector<2x8xf32>
    %7 = vector.multi_reduction <add>, %6, %cst [2] : vector<2x8x32xf32> to vector<2x8xf32>
    %c0_6 = arith.constant 0 : index
    %c0_7 = arith.constant 0 : index
    %8 = vector.load %arg3[%c0_6, %c0_7] : memref<2x8xi32, #tpu.memory_space<vmem>>, vector<2x8xi32>
    %c0_i32_8 = arith.constant 0 : i32
    %9 = vector.broadcast %c0_i32_8 : i32 to vector<2x8xi32>
    %10 = arith.cmpi ne, %8, %9 : vector<2x8xi32>
    %c0_9 = arith.constant 0 : index
    %11 = memref.load %arg5[%c0_9] : memref<1xf32, #tpu.memory_space<smem>>
    %12 = vector.broadcast %11 : f32 to vector<2x8xf32>
    %13 = arith.addf %7, %12 : vector<2x8xf32>
    %cst_10 = arith.constant -1.000000e+09 : f32
    %14 = vector.broadcast %cst_10 : f32 to vector<2x8xf32>
    %15 = arith.select %10, %13, %14 : vector<2x8xi1>, vector<2x8xf32>
    %c0_11 = arith.constant 0 : index
    %c0_12 = arith.constant 0 : index
    %16 = vector.load %arg7[%c0_11, %c0_12] : memref<2x1xf32, #tpu.memory_space<vmem>>, vector<2x1xf32>
    %cst_13 = arith.constant dense<0xFF800000> : vector<2xf32>
    %17 = vector.multi_reduction <maximumf>, %15, %cst_13 [1] : vector<2x8xf32> to vector<2xf32>
    %18 = vector.shape_cast %17 : vector<2xf32> to vector<2x1xf32>
    %19 = arith.maximumf %16, %18 : vector<2x1xf32>
    %20 = arith.subf %16, %19 : vector<2x1xf32>
    %21 = math.exp %20 : vector<2x1xf32>
    %22 = vector.broadcast %19 : vector<2x1xf32> to vector<2x8xf32>
    %23 = arith.subf %15, %22 : vector<2x8xf32>
    %24 = math.exp %23 : vector<2x8xf32>
    %c0_14 = arith.constant 0 : index
    %c0_15 = arith.constant 0 : index
    %25 = vector.load %arg8[%c0_14, %c0_15] : memref<2x1xf32, #tpu.memory_space<vmem>>, vector<2x1xf32>
    %26 = arith.mulf %21, %25 : vector<2x1xf32>
    %cst_16 = arith.constant dense<0.000000e+00> : vector<2xf32>
    %27 = vector.multi_reduction <add>, %24, %cst_16 [1] : vector<2x8xf32> to vector<2xf32>
    %28 = vector.shape_cast %27 : vector<2xf32> to vector<2x1xf32>
    %29 = arith.addf %26, %28 : vector<2x1xf32>
    %c0_17 = arith.constant 0 : index
    %c0_18 = arith.constant 0 : index
    %30 = vector.load %arg8[%c0_17, %c0_18] : memref<2x1xf32, #tpu.memory_space<vmem>>, vector<2x1xf32>
    tpu.vector_store %arg8[%c0_17, %c0_18], %29 {strides = array<i32>} : memref<2x1xf32, #tpu.memory_space<vmem>>, vector<2x1xf32>,
    %31 = vector.shape_cast %24 : vector<2x8xf32> to vector<2x1x8xf32>
    "tpu.trace_start"() <{level = 10 : i32, message = "tks,tsh->tkh"}> : () -> ()
    %cst_19 = arith.constant dense<0.000000e+00> : vector<2x1x32xf32>
    %32 = tpu.matmul %31, %3, %cst_19 {dimension_numbers = #tpu.dot_dimension_numbers<[2], [1], [1], [2], [0, 0, 0, 1, 1, 2], [0], [0]>} : vector<2x1x8xf32>, vector<2x8x32xf32>, vector<2x1x32xf32> -> vector<2x1x32xf32>
    "tpu.trace_stop"() : () -> ()
    %c0_20 = arith.constant 0 : index
    %c0_21 = arith.constant 0 : index
    %33 = vector.load %arg9[%c0_20, %c0_21] : memref<2x32xf32, #tpu.memory_space<vmem>>, vector<2x32xf32>
    %34 = vector.broadcast %21 : vector<2x1xf32> to vector<2x32xf32>
    %35 = arith.mulf %34, %33 : vector<2x32xf32>
    %36 = vector.shape_cast %32 : vector<2x1x32xf32> to vector<2x32xf32>
    %37 = arith.addf %35, %36 : vector<2x32xf32>
    %c0_22 = arith.constant 0 : index
    %c0_23 = arith.constant 0 : index
    %38 = vector.load %arg9[%c0_22, %c0_23] : memref<2x32xf32, #tpu.memory_space<vmem>>, vector<2x32xf32>
    tpu.vector_store %arg9[%c0_22, %c0_23], %37 {strides = array<i32>} : memref<2x32xf32, #tpu.memory_space<vmem>>, vector<2x32xf32>,
    %c0_24 = arith.constant 0 : index
    %c0_25 = arith.constant 0 : index
    %39 = vector.load %arg7[%c0_24, %c0_25] : memref<2x1xf32, #tpu.memory_space<vmem>>, vector<2x1xf32>
    tpu.vector_store %arg7[%c0_24, %c0_25], %19 {strides = array<i32>} : memref<2x1xf32, #tpu.memory_space<vmem>>, vector<2x1xf32>,
    %c0_i32_26 = arith.constant 0 : i32
    %40 = arith.cmpi eq, %arg1, %c0_i32_26 : i32
    %41 = arith.extui %40 : i1 to i32
    %c0_i32_27 = arith.constant 0 : i32
    %42 = arith.cmpi ne, %41, %c0_i32_27 : i32
    scf.if %42 {
      %c0_28 = arith.constant 0 : index
      %c0_29 = arith.constant 0 : index
      %43 = vector.load %arg9[%c0_28, %c0_29] : memref<2x32xf32, #tpu.memory_space<vmem>>, vector<2x32xf32>
      %c0_30 = arith.constant 0 : index
      %c0_31 = arith.constant 0 : index
      %44 = vector.load %arg8[%c0_30, %c0_31] : memref<2x1xf32, #tpu.memory_space<vmem>>, vector<2x1xf32>
      %45 = vector.broadcast %44 : vector<2x1xf32> to vector<2x32xf32>
      %46 = arith.divf %43, %45 : vector<2x32xf32>
      %c0_32 = arith.constant 0 : index
      %c0_33 = arith.constant 0 : index
      %47 = vector.load %arg6[%c0_32, %c0_33] : memref<2x32xf32, #tpu.memory_space<vmem>>, vector<2x32xf32>
      tpu.vector_store %arg6[%c0_32, %c0_33], %46 {strides = array<i32>} : memref<2x32xf32, #tpu.memory_space<vmem>>, vector<2x32xf32>,
    } else {
    }
    return
  }
  func.func @transform_0(%arg0: i32, %arg1: i32) -> (i32, i32, i32) {
    %c0_i32 = arith.constant 0 : i32
    %c0_i32_0 = arith.constant 0 : i32
    return %arg0, %arg1, %c0_i32 : i32, i32, i32
  }
  func.func @transform_1(%arg0: i32, %arg1: i32) -> (i32, i32) {
    %c0_i32 = arith.constant 0 : i32
    return %arg0, %arg1 : i32, i32
  }
  func.func @transform_2(%arg0: i32, %arg1: i32) -> (i32, i32, i32) {
    %c0_i32 = arith.constant 0 : i32
    %c0_i32_0 = arith.constant 0 : i32
    %c0_i32_1 = arith.constant 0 : i32
    %c0_i32_2 = arith.constant 0 : i32
    return %c0_i32, %c0_i32_0, %c0_i32_1 : i32, i32, i32
  }
  func.func @transform_3(%arg0: i32, %arg1: i32) -> i32 {
    %c0_i32 = arith.constant 0 : i32
    %c0_i32_0 = arith.constant 0 : i32
    return %c0_i32 : i32
  }
  func.func @transform_4(%arg0: i32, %arg1: i32) -> (i32, i32) {
    %c0_i32 = arith.constant 0 : i32
    %c0_i32_0 = arith.constant 0 : i32
    return %arg0, %c0_i32 : i32, i32
  }
}

</mosaic_0001>

<bundles_post_ra>
// kernel: tpu_custom_call.1
= control target key start
LH: loop header
LB: loop body
LE: loop exit
PB: predicated region body
PF: predicated region fallthrough
CT: control target
= control target key end

     0   :  { %10 = vsyncpa [#allocation7], 0  ;;  %s479_s0 = inlined_call_operand.hbm [shape: f32[2,8,32], index: 0, kind: input, shape index: {}]   ;;  %s480_s1 = inlined_call_operand.vmem [shape: s32[2,8], index: 1, kind: input, shape index: {}]   ;;  %s481_s2 = inlined_call_operand.vmem [shape: f32[1,1,32], index: 2, kind: input, shape index: {}]   ;;  %s482_s3 = inlined_call_operand.<no memory space> [shape: f32[1], index: 3, kind: input, shape index: {}]   ;;  %s483_s4 = inlined_call_operand.hbm [shape: f32[2,32], index: 4, kind: output, shape index: {}]  }
   0x1   :  { %11 = vsyncpa [#allocation8], 0  ;;  %s401_s15 = smov [#allocation6]   ;;  %s353_s19 = scalar_lea.hbm %s479_s0, 256 }
   0x2   :  { %s17_s16 = sshll.u32 %s401_s15, 4  ;;  %p354_p0 = scmp.ne.s32.totalorder %s479_s0, %s353_s19  ;;  %s18_s16 = int_to_ptr.vmem [resolvable:$true] %s17_s16 }
   0x3   :  { %p357_p1 = scmp.lt.u32.totalorder %s353_s19, %s479_s0 }
   0x5   :  { %p359_p2 = pnand %p357_p1, %p354_p0 }
   0x7   :  { %362 = shalt.err (!%p359_p2)
}
   0x8   :  { %s363_s24 = scalar_lea.vmem %s18_s16, 256  ;;  %p368_p4 = scmp.lt.s32.totalorder %s18_s16, %s18_s16 }
   0x9   :  { %p364_p3 = scmp.ne.s32.totalorder %s18_s16, %s363_s24  ;;  %p369_p5 = scmp.lt.s32.totalorder %s363_s24, %s363_s24 }
   0xb   :  { %p370_p6 = por %p369_p5, %p368_p4 }
   0xd   :  { %p371_p7 = pnand %p370_p6, %p364_p3 }
   0xf   :  { %374 = shalt.err (!%p371_p7)
}
  0x10   :  { %s402_s25 = smov 128   ;;  %s403_s26 = smov 8  }
  0x11   :  { %23 = dma.hbm_to_vmem [thread:$0]  %s479_s0, 256, %s18_s16, [#allocation7], %s402_s25, %s402_s25, %s403_s26  }
  0x12   :  { %397 = dma.done.wait [#allocation7], 256  }
  0x13   :  { %398 = vsyncadd [#allocation7], 4294967040  ;;  %v42_v0 = vld [vmem:[#allocation6] sm:$0xff]  ;;  %v319_v1 = vld [vmem:[%s481_s2] ss:$0 sm:$0xff]  ;;  %vm53_vm0 = vcmask 261120   ;;  %v68_v8 = vlaneseq  ;;  %v63_v11 = vstv %s482_s3 }
  0x14   :  { %v43_v2 = vld [vmem:[#allocation6 + $0x8] sm:$0xff]  ;;  %v51_v3 = vmul.f32 %v319_v1, %v42_v0  ;;  %vm37_vm1 = vcmask 1024   ;;  %v404_v7 = vmov -inf   ;;  %v60_v16 = vld [vmem:[%s480_s1] sm:$0x3]  ;;  %vm78_vm2 = vcmask 1041409  }
  0x15   :  { %v52_v4 = vmul.f32 %v319_v1, %v43_v2  ;;  %38 = vst.msk [vmem:[#allocation2] sm:$0x3] %vm37_vm1, %v404_v7  ;;  %v69_v9 = vand.u32 127, %v68_v8  ;;  %v71_v10 = vshrl.u32 %v68_v8, 7  ;;  %vm61_vm3 = vcmp.ne.s32.totalorder %v60_v16, 0  ;;  %s409_s1 = smov [#allocation9]  }
  0x16   :  { %v54_v5 = vsel %vm53_vm0, %v51_v3, 0.0  ;;  %vm83_vm4 = vcmask 58368   ;;  %v405_v23 = vmov 0   ;;  %v406_v24 = vmov 0.0   ;;  %s310_s3 = sshll.u32 %s409_s1, 4  ;;  %s311_s3 = int_to_ptr.vmem [resolvable:$true] %s310_s3 }
  0x17   :  { %55 = vadd.xlane.f32.xlu0 %v54_v5  ;;  %v57_v6 = vsel %vm53_vm0, %v52_v4, 0.0  ;;  %v72_v13 = vsub.s32 %v69_v9, %v71_v10  ;;  %345 = vset.pattern.permute.xlu1 %v405_v23  ;;  %39 = vst.msk [vmem:[#allocation3] sm:$0x3] %vm37_vm1, %v406_v24  ;;  %vm407_vm5 = vmmov 0   ;;  %v408_v32 = vmov 1966171168   ;;  %p380_p9 = scmp.lt.s32.totalorder %s311_s3, %s311_s3 }
  0x18   :  { %346 = vset.pattern.permute.xlu0 %v405_v23  ;;  %326 = vmatprep.subr.mxu0 %v406_v24  ;;  %v109_v33 = vunpack.c.l.s4 %v408_v32  ;;  %vm130_vm6 = vcmask 64512   ;;  %vm40_vm7 = vcmask 254976   ;;  %s375_s7 = scalar_lea.vmem %s311_s3, 32 }
  0x19   :  { %331 = vmatprep.subr.mxu1 %v406_v24  ;;  %327 = vmatpush3.msra.mxu0 %v42_v0  ;;  %41 = vst.msk [vmem:[#allocation4] sm:$0x3] %vm40_vm7, %v406_v24  ;;  %p376_p8 = scmp.ne.s32.totalorder %s311_s3, %s375_s7  ;;  %p381_p10 = scmp.lt.s32.totalorder %s375_s7, %s375_s7 }
  0x1a   :  { %332 = vmatpush3.msra.mxu1 %v43_v2  ;;  %328 = vmatprep.mubr.msk.f32.mxu0 %vm407_vm5, %v406_v24  ;;  %v110_v34 = vunpack.c.0.s8 %v109_v33 }
  0x1b   :  { %58 = vadd.xlane.f32.xlu0 %v57_v6  ;;  %333 = vmatprep.mubr.msk.f32.mxu1 %vm407_vm5, %v406_v24  ;;  %p382_p11 = por %p381_p10, %p380_p9 }
  0x1c   :  { %v82_v25 = vld [vmem:[#allocation2] sm:$0x3]  ;;  %v113_v35 = vsub.s32 %v110_v34, %v71_v10 }
  0x1d   :  { %p383_p12 = pnand %p382_p11, %p376_p8 }
  0x1e   :  { %v99_v44 = vld [vmem:[#allocation3] sm:$0x3] }
  0x20   :  { %v275_v50 = vld [vmem:[#allocation4] sm:$0x3] }
  0xa4   :  { %v56_v12 = vpop.xlane.xlu0 %55 }
  0xa5   :  { %v64_v14 = vadd.f32 %v63_v11, %v56_v12 }
  0xa7   :  { %v73_v18 = vrot.slane %v64_v14, %v72_v13 }
  0xa8   :  { %v59_v15 = vpop.xlane.xlu0 %58 }
  0xa9   :  { %v65_v17 = vadd.f32 %v63_v11, %v59_v15 }
  0xab   :  { %v77_v19 = vrot.slane %v65_v17, %v72_v13 }
  0xad   :  { %v79_v20 = vsel %vm78_vm2, %v77_v19, %v73_v18 }
  0xae   :  { %v81_v21 = vsel %vm61_vm3, %v79_v20, -1e+09 }
  0xaf   :  { %v84_v22 = vsel %vm83_vm4, %v81_v21, -inf }
  0xb0   :  { %85 = vmax.xlane.f32.xlu1 %v84_v22 }
 0x13d   :  { %v86_v26 = vpop.xlane.xlu1 %85 }
 0x13e   :  { %v87_v27 = vmax.f32 %v82_v25, %v86_v26 }
 0x140   :  { %v88_v28 = vsub.f32 %v82_v25, %v87_v27  ;;  %290 = vst.msk [vmem:[#allocation2] sm:$0x3] %vm37_vm1, %v87_v27  ;;  %93 = vperm.xlu1 %345, %v87_v27  }
 0x142   :  { %v89_v42 = vmul.f32 1.442695, %v88_v28 }
 0x1bf   :  { %v94_v29 = vpop.permute.xlu1 %93 }
 0x1c0   :  { %v96_v30 = vsub.f32 %v81_v21, %v94_v29 }
 0x1c2   :  { %v97_v31 = vmul.f32 1.442695, %v96_v30 }
 0x1c4   :  { %347 = vpow2.f32 %v97_v31 }
 0x1c5   :  { %349 = vpow2.f32 %v89_v42 }
 0x1ce   :  { %v348_v36 = vpop.eup %347 }
 0x1cf   :  { %v101_v37 = vsel %vm83_vm4, %v348_v36, 0.0  ;;  %v114_v38 = vrot.slane %v348_v36, %v113_v35  ;;  %v350_v43 = vpop.eup %349 }
 0x1d0   :  { %102 = vadd.xlane.f32.xlu0 %v101_v37  ;;  %v100_v45 = vmul.f32 %v350_v43, %v99_v44 }
 0x1d1   :  { %v122_v39 = vrot.slane %v114_v38, %v113_v35  ;;  %v115_v40 = vcombine.high %v114_v38, %v114_v38 }
 0x1d3   :  { %329 = vmatmul.mubr.msk.f32.vlgmr.msra.gmra.mrb[0].mxu0 %vm130_vm6, %v122_v39  ;;  %v129_v41 = vrot.slane %v115_v40, %v113_v35 }
 0x1d5   :  { %334 = vmatmul.mubr.msk.f32.vlgmr.msra.gmra.mrb[0].mxu1 %vm130_vm6, %v129_v41 }
 0x1e6   :  { %278 = vperm.xlu0 %346, %v350_v43  }
 0x25d   :  { %v103_v46 = vpop.xlane.xlu0 %102 }
 0x25e   :  { %v104_v47 = vadd.f32 %v103_v46, %v100_v45 }
 0x260   :  { %106 = vst.msk [vmem:[#allocation3] sm:$0x3] %vm37_vm1, %v104_v47 }
 0x265   :  { %v279_v51 = vpop.permute.xlu0 %278 }
 0x266   :  { %v281_v56 = vmul.f32 %v279_v51, %v275_v50 }
 0x267   :  { %v295_v48 = vld [vmem:[#allocation3] sm:$0x3] }
 0x268   :  { %298 = vperm.xlu1 %345, %v295_v48  }
 0x2a6   :  { %v199_v49 = vpop.f32.mrb[0].mxu0 }
 0x2a7   :  { %v330_v52 = vpop.f32.mrb[1].mxu0 }
 0x2a8   :  { %v271_v53 = vpop.f32.mrb[0].mxu1 }
 0x2a9   :  { %v284_v54 = vrot.slane %v271_v53, 7  ;;  %v335_v55 = vpop.f32.mrb[1].mxu1 }
 0x2ab   :  { %v285_v57 = vsel %vm78_vm2, %v284_v54, %v199_v49 }
 0x2ac   :  { %v287_v58 = vadd.f32 %v285_v57, %v281_v56 }
 0x2ae   :  { %289 = vst.msk [vmem:[#allocation4] sm:$0x3] %vm40_vm7, %v287_v58 }
 0x2b5   :  { %v294_v61 = vld [vmem:[#allocation4] sm:$0x3] }
 0x2e7   :  { %v299_v59 = vpop.permute.xlu1 %298 }
 0x2e8   :  { %351 = vrcp.f32 %v299_v59 }
 0x2f2   :  { %v352_v60 = vpop.eup %351 }
 0x2f3   :  { %v302_v62 = vmul.f32 %v352_v60, %v294_v61 }
 0x2f5   :  { %303 = vst.msk [vmem:[#allocation9] sm:$0x3] %vm40_vm7, %v302_v62 }
 0x2f6   :  { %386 = shalt.err (!%p383_p12)
}
 0x2f7   :  { %s387_s10 = scalar_lea.hbm %s483_s4, 32 }
 0x2f8   :  { %p388_p13 = scmp.ne.s32.totalorder %s483_s4, %s387_s10  ;;  %p391_p0 = scmp.lt.u32.totalorder %s387_s10, %s483_s4 }
 0x2fa   :  { %p393_p1 = pnand %p391_p0, %p388_p13 }
 0x2fc   :  { %396 = shalt.err (!%p393_p1)
}
 0x2fd   :  { %313 = dma.vmem_to_hbm [thread:$0]  %s311_s3, 32, %s483_s4, [#allocation8]  }
 0x2fe   :  { %399 = dma.done.wait [#allocation8], 32  }
 0x2ff   :  { %400 = vsyncadd [#allocation8], 4294967264 }
 0x300   :  { %317 = vsyncpa [#allocation7], 1 }
 0x301   :  { %318 = vsyncpa [#allocation8], 1 }

</bundles_post_ra>
